<compile_context>
chip_gen: v7x
topology: tpu7x:2x2x1
jax: 0.10.0
libtpu: 0.0.40
codegen_flags: <defaults>
</compile_context>

<pallas_src>
import functools
import math

import jax
import jax.numpy as jnp
from jax.experimental import pallas as pl
from jax.experimental.pallas import tpu as pltpu


def _droppath_kernel(x_ref, s_ref, o_ref):
    # x_ref/o_ref: (TB, TND) tile of the flattened input, native dtype.
    # s_ref:       (TB, 1) f32 per-sample scale (mask / keep_prob),
    #              sublane-broadcast by the VPU.
    o_ref[...] = (x_ref[...] * s_ref[...]).astype(o_ref.dtype)


def _largest_divisor(n, align, cap):
    """Largest d with n % d == 0, d % align == 0 and d <= cap (None if none)."""
    best = None
    d = align
    limit = min(n, cap)
    while d <= limit:
        if n % d == 0:
            best = d
        d += align
    return best


def _pick_tiles(B, ND, itemsize):
    """Pick a lane-dense (TB, TND) block targeting ~2 MiB per buffer."""
    target = 2 << 20  # 2 MiB per x/out tile -> <= ~8 MiB double-buffered; v7x-safe
    sub = {4: 8, 2: 16, 1: 32}.get(itemsize, 8)
    if B * ND * itemsize <= target:
        return B, ND  # whole tensor fits in one block (full-extent dims are legal)
    # Lane tile first (lane-dense output): largest multiple-of-128 divisor of ND
    # such that one sublane-group strip stays within the budget.
    tnd = _largest_divisor(ND, 128, max(128, target // (itemsize * sub))) or ND
    # Row tile: fill the remaining budget with a sublane-aligned divisor of B.
    tb = _largest_divisor(B, sub, max(1, target // (itemsize * tnd))) or B
    if tb == B and tb * tnd * itemsize > (8 << 20):
        # Full-batch fallback got too big; re-shrink the lane tile.
        tnd = _largest_divisor(ND, 128, max(128, (4 * target) // (itemsize * B))) or tnd
    return tb, tnd


@functools.partial(jax.jit, static_argnames=("drop_prob", "training"))
def drop_path(x, key, *, drop_prob=0.0, training=True):
    """Pallas implementation of DropPath.forward (layout-agnostic trailing dims)."""
    if drop_prob == 0.0 or not training:
        return x

    keep_prob = 1.0 - drop_prob
    B = x.shape[0]
    ND = math.prod(x.shape[1:])

    # Per-sample binary mask, same construction as the torch code:
    # floor(keep_prob + U[0,1))  ->  1 with prob keep_prob, else 0.
    u = jax.random.uniform(key, (B, 1), dtype=jnp.float32)
    mask = jnp.floor(keep_prob + u)
    scale = (mask / keep_prob).astype(jnp.float32)      # (B, 1)

    x2 = x.reshape(B, ND)                               # lane-dense 2-D view
    itemsize = x2.dtype.itemsize
    TB, TND = _pick_tiles(B, ND, itemsize)
    grid = (pl.cdiv(B, TB), pl.cdiv(ND, TND))

    tile_bytes = TB * TND * itemsize
    # Double-buffered x input + output (+ tiny scale) plus headroom.
    vmem_bytes = max(int(4 * tile_bytes + 4 * TB * 4 + (2 << 20)), 16 << 20)

    out2 = pl.pallas_call(
        _droppath_kernel,
        out_shape=jax.ShapeDtypeStruct((B, ND), x.dtype),
        grid=grid,
        in_specs=[
            pl.BlockSpec((TB, TND), lambda i, j: (i, j)),
            pl.BlockSpec((TB, 1), lambda i, j: (i, 0)),
        ],
        out_specs=pl.BlockSpec((TB, TND), lambda i, j: (i, j)),
        compiler_params=pltpu.CompilerParams(
            dimension_semantics=("parallel", "parallel"),
            vmem_limit_bytes=vmem_bytes,
        ),
        cost_estimate=pl.CostEstimate(
            flops=x.size,
            transcendentals=0,
            bytes_accessed=2 * x2.size * itemsize + B * 4,
        ),
    )(x2, scale)

    return out2.reshape(x.shape)


if __name__ == "__main__":
    key = jax.random.PRNGKey(0)
    kx, kmask = jax.random.split(key)

    B, N, D = 4, 8, 32
    x = jax.random.normal(kx, (B, N, D), dtype=jnp.float32)
    drop_prob = 0.25
    keep_prob = 1.0 - drop_prob

    # --- training path (kernel) ---
    out = drop_path(x, kmask, drop_prob=drop_prob, training=True)
    out = jax.block_until_ready(out)

    # Pure-JAX reference with identical mask construction.
    u = jax.random.uniform(kmask, (B, 1), dtype=jnp.float32)
    mask = jnp.floor(keep_prob + u)
    scale_ref = (mask / keep_prob)[:, :, None]           # (B, 1, 1)
    ref = x * scale_ref
    assert out.shape == x.shape and out.dtype == x.dtype
    assert jnp.allclose(out, ref, atol=1e-6, rtol=1e-6)

    # --- bf16 path: native-dtype DMA, upcast inside the kernel multiply ---
    xb = x.astype(jnp.bfloat16)
    outb = jax.block_until_ready(
        drop_path(xb, kmask, drop_prob=drop_prob, training=True))
    refb = (xb.astype(jnp.float32) * scale_ref).astype(jnp.bfloat16)
    assert outb.dtype == jnp.bfloat16
    assert jnp.allclose(outb.astype(jnp.float32), refb.astype(jnp.float32),
                        atol=1e-2, rtol=1e-2)

    # --- eval / drop_prob == 0 path (identity) ---
    out_eval = drop_path(x, kmask, drop_prob=drop_prob, training=False)
    out_p0 = drop_path(x, kmask, drop_prob=0.0, training=True)
    assert jnp.array_equal(out_eval, x)
    assert jnp.array_equal(out_p0, x)

    print("KERNEL_OK")
</pallas_src>

<mosaic_0001>
module attributes {stable_mosaic.version = 11 : i64} {
  func.func @_droppath_kernel(%arg0: i32, %arg1: i32, %arg2: memref<4x256xf32, #tpu.memory_space<vmem>>, %arg3: memref<4x1xf32, #tpu.memory_space<vmem>>, %arg4: memref<4x256xf32, #tpu.memory_space<vmem>>) attributes {dimension_semantics = [#tpu.dimension_semantics<parallel>, #tpu.dimension_semantics<parallel>], iteration_bounds = array<i64: 1, 1>, scalar_prefetch = 0 : i64, scratch_operands = 0 : i64, tpu.core_type = #tpu.core_type<tc>, window_params = [{transform_indices = @transform_0, window_bounds = array<i64: 4, 256>}, {transform_indices = @transform_1, window_bounds = array<i64: 4, 1>}, {transform_indices = @transform_2, window_bounds = array<i64: 4, 256>}]} {
    %c0 = arith.constant 0 : index
    %c0_0 = arith.constant 0 : index
    %0 = vector.load %arg2[%c0, %c0_0] : memref<4x256xf32, #tpu.memory_space<vmem>>, vector<4x256xf32>
    %c0_1 = arith.constant 0 : index
    %c0_2 = arith.constant 0 : index
    %1 = vector.load %arg3[%c0_1, %c0_2] : memref<4x1xf32, #tpu.memory_space<vmem>>, vector<4x1xf32>
    %2 = vector.broadcast %1 : vector<4x1xf32> to vector<4x256xf32>
    %3 = arith.mulf %0, %2 : vector<4x256xf32>
    %c0_3 = arith.constant 0 : index
    %c0_4 = arith.constant 0 : index
    %4 = vector.load %arg4[%c0_3, %c0_4] : memref<4x256xf32, #tpu.memory_space<vmem>>, vector<4x256xf32>
    tpu.vector_store %arg4[%c0_3, %c0_4], %3 {strides = array<i32>} : memref<4x256xf32, #tpu.memory_space<vmem>>, vector<4x256xf32>,
    return
  }
  func.func @transform_0(%arg0: i32, %arg1: i32) -> (i32, i32) {
    %c0_i32 = arith.constant 0 : i32
    return %arg0, %arg1 : i32, i32
  }
  func.func @transform_1(%arg0: i32, %arg1: i32) -> (i32, i32) {
    %c0_i32 = arith.constant 0 : i32
    %c0_i32_0 = arith.constant 0 : i32
    return %arg0, %c0_i32 : i32, i32
  }
  func.func @transform_2(%arg0: i32, %arg1: i32) -> (i32, i32) {
    %c0_i32 = arith.constant 0 : i32
    return %arg0, %arg1 : i32, i32
  }
}

</mosaic_0001>

<bundles_post_ra>
// kernel: drop_path.1
= control target key start
LH: loop header
LB: loop body
LE: loop exit
PB: predicated region body
PF: predicated region fallthrough
CT: control target
= control target key end

     0   :  { %v34_v0 = vmov 0   ;;  %v35_v2 = vmov 839922192   ;;  %v20_v4 = vlaneseq  ;;  %s60_s1 = inlined_call_operand.vmem [shape: f32[4,1], index: 1, kind: input, shape index: {}]   ;;  %s61_s0 = inlined_call_operand.vmem [shape: f32[4,256], index: 0, kind: input, shape index: {}]   ;;  %s62_s2 = inlined_call_operand.vmem [shape: f32[4,256], index: 2, kind: output, shape index: {}]  }
   0x1   :  { %33 = vset.pattern.permute.xlu0 %v34_v0  ;;  %v12_v1 = vld [vmem:[%s60_s1] sm:$0xf]  ;;  %v18_v3 = vunpack.c.l.s4 %v35_v2 }
   0x2   :  { %15 = vperm.xlu0 %33, %v12_v1   ;;  %v21_v6 = vshrl.u32 %v20_v4, 7  ;;  %v11_v9 = vld [vmem:[%s61_s0] sm:$0xff] }
   0x3   :  { %v19_v5 = vunpack.c.0.s8 %v18_v3 }
   0x5   :  { %v22_v7 = vsub.s32 %v19_v5, %v21_v6 }
  0x81   :  { %v16_v8 = vpop.permute.xlu0 %15 }
  0x82   :  { %v23_v10 = vrot.slane %v16_v8, %v22_v7 }
  0x84   :  { %v25_v11 = vmul.f32 %v23_v10, %v11_v9 }
  0x86   :  { %26 = vst [vmem:[%s62_s2] sm:$0xff] %v25_v11 }

</bundles_post_ra>
